<compile_context>
chip_gen: v6e
topology: v6e:2x2x1
jax: 0.10.0
libtpu: 0.0.40
codegen_flags: <defaults>
</compile_context>

<pallas_src>
import functools
import math

import jax
import jax.numpy as jnp
from jax import lax
from jax.experimental import pallas as pl
from jax.experimental.pallas import tpu as pltpu


def _mha_flash_kernel(x_ref, kv_ref, wq_ref, wk_ref, wv_ref, wfc_ref, o_ref,
                      q_scr, m_scr, l_scr, acc_scr,
                      *, n_heads, dim_attn, dim_val, scale):
    """One (batch, q-tile, kv-tile) grid step of fused multi-head attention.

    x_ref   : (1, tq,  dim_val)       query-side activations (compute dtype)
    kv_ref  : (1, tkv, dim_val)       key/value-side activations
    wq_ref  : (dim_val, H*dim_attn)   fused, contraction-major Q weights
    wk_ref  : (dim_val, H*dim_attn)   fused, contraction-major K weights
    wv_ref  : (dim_val, H*dim_val)    fused, contraction-major V weights
    wfc_ref : (H*dim_val, dim_val)    head-major output-projection weights
    o_ref   : (1, tq, dim_val)        output tile
    q_scr   : (tq, H*dim_attn)        cached Q projection for this q tile
    m_scr   : (H, tq, 1)   f32        running row max (per head)
    l_scr   : (H, tq, 1)   f32        running softmax denominator (per head)
    acc_scr : (H, tq, dim_val) f32    running (unnormalized) P @ V (per head)
    """
    ki = pl.program_id(2)
    n_kv = pl.num_programs(2)

    @pl.when(ki == 0)
    def _init():
        x = x_ref[0]                                                  # (tq, dim_val)
        # Wide (all-heads) Q projection, computed once per q tile.
        q_scr[...] = jnp.dot(
            x, wq_ref[...], preferred_element_type=jnp.float32).astype(q_scr.dtype)
        m_scr[...] = jnp.full(m_scr.shape, -jnp.inf, dtype=m_scr.dtype)
        l_scr[...] = jnp.zeros(l_scr.shape, dtype=l_scr.dtype)
        acc_scr[...] = jnp.zeros(acc_scr.shape, dtype=acc_scr.dtype)

    kv = kv_ref[0]                                                    # (tkv, dim_val)
    # Wide (all-heads) K / V projections: one MXU pass over the kv tile each.
    k_all = jnp.dot(kv, wk_ref[...],
                    preferred_element_type=jnp.float32).astype(kv.dtype)  # (tkv, H*da)
    v_all = jnp.dot(kv, wv_ref[...],
                    preferred_element_type=jnp.float32).astype(kv.dtype)  # (tkv, H*dv)

    # TODO(synk): if n_heads grows, turn this static unroll into a grid axis or
    # lax.fori_loop so live ranges stay bounded; fine for small head counts.
    for h in range(n_heads):
        q_h = q_scr[:, h * dim_attn:(h + 1) * dim_attn]               # (tq,  da)
        k_h = k_all[:, h * dim_attn:(h + 1) * dim_attn]               # (tkv, da)
        v_h = v_all[:, h * dim_val:(h + 1) * dim_val]                 # (tkv, dv)

        # Q @ K^T via dot_general contracting the last dims -- no transpose.
        s = lax.dot_general(q_h, k_h, (((1,), (1,)), ((), ())),
                            preferred_element_type=jnp.float32) * scale  # (tq, tkv)

        m_prev = m_scr[h]                                             # (tq, 1)
        m_new = jnp.maximum(m_prev, jnp.max(s, axis=-1, keepdims=True))
        alpha = jnp.exp(m_prev - m_new)
        p = jnp.exp(s - m_new)                                        # f32

        l_scr[h] = alpha * l_scr[h] + jnp.sum(p, axis=-1, keepdims=True)
        acc_scr[h] = alpha * acc_scr[h] + jnp.dot(
            p.astype(v_h.dtype), v_h, preferred_element_type=jnp.float32)
        m_scr[h] = m_new

    @pl.when(ki == n_kv - 1)
    def _finalize():
        # Normalize each head (EUP reciprocal), pack heads head-major along lanes,
        # then fuse the output projection into one wide (K = H*dim_val) matmul.
        parts = []
        for h in range(n_heads):
            inv_l = pl.reciprocal(l_scr[h], approx=True)              # (tq, 1)
            parts.append((acc_scr[h] * inv_l).astype(wfc_ref.dtype))
        a_all = jnp.concatenate(parts, axis=-1)                       # (tq, H*dv)
        # NOTE: if dim_val < 128 in a real deployment, pad the output feature dim
        # to 128 for lane-dense (unmasked) stores.
        o_ref[0] = jnp.dot(a_all, wfc_ref[...],
                           preferred_element_type=jnp.float32).astype(o_ref.dtype)


def _choose_tile(n, target):
    """Largest tile <= target that divides n and is a multiple of 8, else full n."""
    t = min(n, max(int(target), 1))
    if t == n:
        return n
    t = (t // 8) * 8
    while t >= 8:
        if n % t == 0:
            return t
        t -= 8
    return n


def _vmem_limit_bytes(tq, tkv, dim_val, n_heads, dim_attn, compute_dtype):
    """Rough VMEM budget (double-buffered blocks + scratch) with headroom."""
    cb = jnp.dtype(compute_dtype).itemsize
    lane = 128
    blocks = (
        tq * dim_val * cb + tkv * dim_val * cb
        + 2 * dim_val * n_heads * dim_attn * cb
        + dim_val * n_heads * dim_val * cb
        + n_heads * dim_val * dim_val * cb
        + tq * dim_val * 4
    )
    scratch = (
        tq * n_heads * dim_attn * cb
        + 2 * n_heads * tq * lane * 4
        + n_heads * tq * max(dim_val, lane) * 4
    )
    est = 2 * blocks + scratch
    # Clamp to [32 MiB, 48 MiB]: >= common defaults, below v7x's 64 MiB ceiling.
    return min(max(int(1.25 * est) + (2 << 20), 32 << 20), 48 << 20)


def multi_head_attention_block(x, wq, wk, wv, wfc, kv=None, *,
                               compute_dtype=jnp.bfloat16,
                               q_tile=256, kv_tile=512):
    """Fused MultiHeadAttentionBlock forward.

    x   : (B, Sq, dim_val)
    wq  : (H, dim_attn, dim_val)   per-head query nn.Linear weights (bias=False)
    wk  : (H, dim_attn, dim_val)   per-head key weights
    wv  : (H, dim_val, dim_val)    per-head value weights
    wfc : (dim_val, H*dim_val)     output projection (torch layout, y = a @ W.T;
                                   column d*H + h belongs to head h, feature d)
    kv  : optional (B, Skv, dim_val) cross-attention source (defaults to x)
    """
    if kv is None:
        kv = x
    out_dtype = x.dtype
    B, Sq, dim_val = x.shape
    Bk, Skv, _ = kv.shape
    assert Bk == B
    H, dim_attn, _ = wq.shape

    # ---- host-side, one-time weight layout plumbing (constant-folds under jit) ----
    # contraction-major with all heads fused along the output axis.
    wq_all = jnp.transpose(wq, (2, 0, 1)).reshape(dim_val, H * dim_attn)
    wk_all = jnp.transpose(wk, (2, 0, 1)).reshape(dim_val, H * dim_attn)
    wv_all = jnp.transpose(wv, (2, 0, 1)).reshape(dim_val, H * dim_val)
    # torch stacks heads at dim=-1 then flattens: fc column = d*H + h.  Re-pack as
    # head-major rows of W.T so out = concat_h(A_h) @ wfc_hm.
    wfc_hm = jnp.transpose(wfc.reshape(dim_val, dim_val, H), (2, 1, 0)).reshape(
        H * dim_val, dim_val)

    cd = jnp.dtype(compute_dtype)
    xc = x.astype(cd)
    kvc = kv.astype(cd)
    wq_all = wq_all.astype(cd)
    wk_all = wk_all.astype(cd)
    wv_all = wv_all.astype(cd)
    wfc_hm = wfc_hm.astype(cd)

    tq = _choose_tile(Sq, q_tile)
    tkv = _choose_tile(Skv, kv_tile)
    grid = (B, Sq // tq, Skv // tkv)
    scale = 1.0 / math.sqrt(dim_attn)

    kernel = functools.partial(_mha_flash_kernel, n_heads=H, dim_attn=dim_attn,
                               dim_val=dim_val, scale=scale)

    return pl.pallas_call(
        kernel,
        out_shape=jax.ShapeDtypeStruct((B, Sq, dim_val), out_dtype),
        grid_spec=pltpu.PrefetchScalarGridSpec(
            num_scalar_prefetch=0,
            grid=grid,
            in_specs=[
                pl.BlockSpec((1, tq, dim_val), lambda b, qi, ki: (b, qi, 0)),
                pl.BlockSpec((1, tkv, dim_val), lambda b, qi, ki: (b, ki, 0)),
                # Grid-invariant weights: constant index_map => no re-DMA per step.
                pl.BlockSpec((dim_val, H * dim_attn), lambda b, qi, ki: (0, 0)),
                pl.BlockSpec((dim_val, H * dim_attn), lambda b, qi, ki: (0, 0)),
                pl.BlockSpec((dim_val, H * dim_val), lambda b, qi, ki: (0, 0)),
                pl.BlockSpec((H * dim_val, dim_val), lambda b, qi, ki: (0, 0)),
            ],
            out_specs=pl.BlockSpec((1, tq, dim_val), lambda b, qi, ki: (b, qi, 0)),
            scratch_shapes=[
                pltpu.VMEM((tq, H * dim_attn), cd),          # cached Q projection
                pltpu.VMEM((H, tq, 1), jnp.float32),         # running max
                pltpu.VMEM((H, tq, 1), jnp.float32),         # running denominator
                pltpu.VMEM((H, tq, dim_val), jnp.float32),   # running P@V accumulator
            ],
        ),
        compiler_params=pltpu.CompilerParams(
            dimension_semantics=("parallel", "parallel", "arbitrary"),
            vmem_limit_bytes=_vmem_limit_bytes(tq, tkv, dim_val, H, dim_attn, cd),
        ),
    )(xc, kvc, wq_all, wk_all, wv_all, wfc_hm)


def _reference(x, wq, wk, wv, wfc, kv=None):
    """Pure-JAX transcription of the PyTorch forward pass for verification."""
    if kv is None:
        kv = x
    H, dim_attn, _ = wq.shape
    heads = []
    for h in range(H):
        q = x @ wq[h].T
        k = kv @ wk[h].T
        v = kv @ wv[h].T
        s = (q @ jnp.swapaxes(k, -1, -2)) / jnp.sqrt(jnp.float32(dim_attn))
        p = jax.nn.softmax(s, axis=-1)
        heads.append(p @ v)
    a = jnp.stack(heads, axis=-1)                       # (B, S, dim_val, H)
    a = a.reshape(a.shape[0], a.shape[1], -1)           # flatten(start_dim=2)
    return a @ wfc.T


if __name__ == "__main__":
    B, S, dim_val, dim_attn, n_heads = 2, 8, 32, 16, 4
    S_kv = 16

    key = jax.random.PRNGKey(0)
    k_x, k_kv, k_q, k_k, k_v, k_fc = jax.random.split(key, 6)

    x = jax.random.normal(k_x, (B, S, dim_val), jnp.float32)
    kv = jax.random.normal(k_kv, (B, S_kv, dim_val), jnp.float32)

    # deterministic init mimicking torch.nn.Linear default U(-1/sqrt(fan_in), 1/sqrt(fan_in))
    b_in = 1.0 / math.sqrt(dim_val)
    wq = jax.random.uniform(k_q, (n_heads, dim_attn, dim_val), jnp.float32, -b_in, b_in)
    wk = jax.random.uniform(k_k, (n_heads, dim_attn, dim_val), jnp.float32, -b_in, b_in)
    wv = jax.random.uniform(k_v, (n_heads, dim_val, dim_val), jnp.float32, -b_in, b_in)
    b_fc = 1.0 / math.sqrt(n_heads * dim_val)
    wfc = jax.random.uniform(k_fc, (dim_val, n_heads * dim_val), jnp.float32, -b_fc, b_fc)

    ref_self = _reference(x, wq, wk, wv, wfc)

    # 1) self-attention, f32 compute path (tight check)
    out_f32 = jax.block_until_ready(
        multi_head_attention_block(x, wq, wk, wv, wfc, compute_dtype=jnp.float32))
    assert out_f32.shape == (B, S, dim_val)
    err = float(jnp.max(jnp.abs(out_f32 - ref_self)))
    assert err < 2e-3, err

    # 2) self-attention, bf16 MXU operands / f32 accumulation (default fast path)
    out_bf16 = jax.block_until_ready(multi_head_attention_block(x, wq, wk, wv, wfc))
    err = float(jnp.max(jnp.abs(out_bf16 - ref_self)))
    assert err < 8e-2, err

    # 3) cross-attention with a multi-tile kv axis (exercises the online softmax)
    out_x = jax.block_until_ready(
        multi_head_attention_block(x, wq, wk, wv, wfc, kv=kv,
                                   compute_dtype=jnp.float32, kv_tile=8))
    ref_x = _reference(x, wq, wk, wv, wfc, kv=kv)
    err = float(jnp.max(jnp.abs(out_x - ref_x)))
    assert err < 2e-3, err

    print("KERNEL_OK")
</pallas_src>

<mosaic_0001>
module attributes {stable_mosaic.version = 11 : i64} {
  func.func @_mha_flash_kernel(%arg0: i32, %arg1: i32, %arg2: i32, %arg3: memref<1x8x32xf32, #tpu.memory_space<vmem>>, %arg4: memref<1x8x32xf32, #tpu.memory_space<vmem>>, %arg5: memref<32x64xf32, #tpu.memory_space<vmem>>, %arg6: memref<32x64xf32, #tpu.memory_space<vmem>>, %arg7: memref<32x128xf32, #tpu.memory_space<vmem>>, %arg8: memref<128x32xf32, #tpu.memory_space<vmem>>, %arg9: memref<1x8x32xf32, #tpu.memory_space<vmem>>, %arg10: memref<8x64xf32, #tpu.memory_space<vmem>>, %arg11: memref<4x8x1xf32, #tpu.memory_space<vmem>>, %arg12: memref<4x8x1xf32, #tpu.memory_space<vmem>>, %arg13: memref<4x8x32xf32, #tpu.memory_space<vmem>>) attributes {dimension_semantics = [#tpu.dimension_semantics<parallel>, #tpu.dimension_semantics<parallel>, #tpu.dimension_semantics<arbitrary>], iteration_bounds = array<i64: 2, 1, 1>, scalar_prefetch = 0 : i64, scratch_operands = 4 : i64, tpu.core_type = #tpu.core_type<tc>, window_params = [{transform_indices = @transform_0, window_bounds = array<i64: 1, 8, 32>}, {transform_indices = @transform_1, window_bounds = array<i64: 1, 8, 32>}, {pipeline_mode = #tpu.pipeline_mode<synchronous>, transform_indices = @transform_2, window_bounds = array<i64: 32, 64>}, {pipeline_mode = #tpu.pipeline_mode<synchronous>, transform_indices = @transform_3, window_bounds = array<i64: 32, 64>}, {pipeline_mode = #tpu.pipeline_mode<synchronous>, transform_indices = @transform_4, window_bounds = array<i64: 32, 128>}, {pipeline_mode = #tpu.pipeline_mode<synchronous>, transform_indices = @transform_5, window_bounds = array<i64: 128, 32>}, {transform_indices = @transform_6, window_bounds = array<i64: 1, 8, 32>}]} {
    %c0_i32 = arith.constant 0 : i32
    %0 = arith.cmpi eq, %arg2, %c0_i32 : i32
    %1 = arith.extui %0 : i1 to i32
    %c0_i32_0 = arith.constant 0 : i32
    %2 = arith.cmpi ne, %1, %c0_i32_0 : i32
    scf.if %2 {
      %c0_104 = arith.constant 0 : index
      %c0_105 = arith.constant 0 : index
      %c0_106 = arith.constant 0 : index
      %160 = vector.load %arg3[%c0_104, %c0_105, %c0_106] : memref<1x8x32xf32, #tpu.memory_space<vmem>>, vector<1x8x32xf32>
      %161 = vector.shape_cast %160 : vector<1x8x32xf32> to vector<8x32xf32>
      %c0_107 = arith.constant 0 : index
      %c0_108 = arith.constant 0 : index
      %162 = vector.load %arg5[%c0_107, %c0_108] : memref<32x64xf32, #tpu.memory_space<vmem>>, vector<32x64xf32>
      %cst_109 = arith.constant dense<0.000000e+00> : vector<8x64xf32>
      %163 = tpu.matmul %161, %162, %cst_109 {dimension_numbers = #tpu.dot_dimension_numbers<[1], [0], [0], [1], [0, 0, 1, 1], [], []>} : vector<8x32xf32>, vector<32x64xf32>, vector<8x64xf32> -> vector<8x64xf32>
      %c0_110 = arith.constant 0 : index
      %c0_111 = arith.constant 0 : index
      %164 = vector.load %arg10[%c0_110, %c0_111] : memref<8x64xf32, #tpu.memory_space<vmem>>, vector<8x64xf32>
      tpu.vector_store %arg10[%c0_110, %c0_111], %163 {strides = array<i32>} : memref<8x64xf32, #tpu.memory_space<vmem>>, vector<8x64xf32>,
      %cst_112 = arith.constant 0xFF800000 : f32
      %165 = vector.broadcast %cst_112 : f32 to vector<4x8x1xf32>
      %c0_113 = arith.constant 0 : index
      %c0_114 = arith.constant 0 : index
      %c0_115 = arith.constant 0 : index
      %166 = vector.load %arg11[%c0_113, %c0_114, %c0_115] : memref<4x8x1xf32, #tpu.memory_space<vmem>>, vector<4x8x1xf32>
      tpu.vector_store %arg11[%c0_113, %c0_114, %c0_115], %165 {strides = array<i32>} : memref<4x8x1xf32, #tpu.memory_space<vmem>>, vector<4x8x1xf32>,
      %cst_116 = arith.constant 0.000000e+00 : f32
      %167 = vector.broadcast %cst_116 : f32 to vector<4x8x1xf32>
      %c0_117 = arith.constant 0 : index
      %c0_118 = arith.constant 0 : index
      %c0_119 = arith.constant 0 : index
      %168 = vector.load %arg12[%c0_117, %c0_118, %c0_119] : memref<4x8x1xf32, #tpu.memory_space<vmem>>, vector<4x8x1xf32>
      tpu.vector_store %arg12[%c0_117, %c0_118, %c0_119], %167 {strides = array<i32>} : memref<4x8x1xf32, #tpu.memory_space<vmem>>, vector<4x8x1xf32>,
      %cst_120 = arith.constant 0.000000e+00 : f32
      %169 = vector.broadcast %cst_120 : f32 to vector<4x8x32xf32>
      %c0_121 = arith.constant 0 : index
      %c0_122 = arith.constant 0 : index
      %c0_123 = arith.constant 0 : index
      %170 = vector.load %arg13[%c0_121, %c0_122, %c0_123] : memref<4x8x32xf32, #tpu.memory_space<vmem>>, vector<4x8x32xf32>
      tpu.vector_store %arg13[%c0_121, %c0_122, %c0_123], %169 {strides = array<i32>} : memref<4x8x32xf32, #tpu.memory_space<vmem>>, vector<4x8x32xf32>,
    } else {
    }
    %c0 = arith.constant 0 : index
    %c0_1 = arith.constant 0 : index
    %c0_2 = arith.constant 0 : index
    %3 = vector.load %arg4[%c0, %c0_1, %c0_2] : memref<1x8x32xf32, #tpu.memory_space<vmem>>, vector<1x8x32xf32>
    %4 = vector.shape_cast %3 : vector<1x8x32xf32> to vector<8x32xf32>
    %c0_3 = arith.constant 0 : index
    %c0_4 = arith.constant 0 : index
    %5 = vector.load %arg6[%c0_3, %c0_4] : memref<32x64xf32, #tpu.memory_space<vmem>>, vector<32x64xf32>
    %cst = arith.constant dense<0.000000e+00> : vector<8x64xf32>
    %6 = tpu.matmul %4, %5, %cst {dimension_numbers = #tpu.dot_dimension_numbers<[1], [0], [0], [1], [0, 0, 1, 1], [], []>} : vector<8x32xf32>, vector<32x64xf32>, vector<8x64xf32> -> vector<8x64xf32>
    %c0_5 = arith.constant 0 : index
    %c0_6 = arith.constant 0 : index
    %7 = vector.load %arg7[%c0_5, %c0_6] : memref<32x128xf32, #tpu.memory_space<vmem>>, vector<32x128xf32>
    %cst_7 = arith.constant dense<0.000000e+00> : vector<8x128xf32>
    %8 = tpu.matmul %4, %7, %cst_7 {dimension_numbers = #tpu.dot_dimension_numbers<[1], [0], [0], [1], [0, 0, 1, 1], [], []>} : vector<8x32xf32>, vector<32x128xf32>, vector<8x128xf32> -> vector<8x128xf32>
    %c0_8 = arith.constant 0 : index
    %c0_9 = arith.constant 0 : index
    %9 = vector.load %arg10[%c0_8, %c0_9] : memref<8x64xf32, #tpu.memory_space<vmem>>, vector<8x16xf32>
    %10 = vector.extract_strided_slice %6 {offsets = [0, 0], sizes = [8, 16], strides = [1, 1]} : vector<8x64xf32> to vector<8x16xf32>
    %11 = vector.extract_strided_slice %8 {offsets = [0, 0], sizes = [8, 32], strides = [1, 1]} : vector<8x128xf32> to vector<8x32xf32>
    %cst_10 = arith.constant dense<0.000000e+00> : vector<8x8xf32>
    %12 = tpu.matmul %9, %10, %cst_10 {dimension_numbers = #tpu.dot_dimension_numbers<[1], [1], [0], [0], [0, 0, 1, 0], [], []>} : vector<8x16xf32>, vector<8x16xf32>, vector<8x8xf32> -> vector<8x8xf32>
    %cst_11 = arith.constant 2.500000e-01 : f32
    %13 = vector.broadcast %cst_11 : f32 to vector<8x8xf32>
    %14 = arith.mulf %12, %13 : vector<8x8xf32>
    %c0_12 = arith.constant 0 : index
    %c0_13 = arith.constant 0 : index
    %c0_14 = arith.constant 0 : index
    %15 = vector.load %arg11[%c0_12, %c0_13, %c0_14] : memref<4x8x1xf32, #tpu.memory_space<vmem>>, vector<1x8x1xf32>
    %16 = vector.shape_cast %15 : vector<1x8x1xf32> to vector<8x1xf32>
    %cst_15 = arith.constant dense<0xFF800000> : vector<8xf32>
    %17 = vector.multi_reduction <maximumf>, %14, %cst_15 [1] : vector<8x8xf32> to vector<8xf32>
    %18 = vector.shape_cast %17 : vector<8xf32> to vector<8x1xf32>
    %19 = arith.maximumf %16, %18 : vector<8x1xf32>
    %20 = arith.subf %16, %19 : vector<8x1xf32>
    %21 = math.exp %20 : vector<8x1xf32>
    %22 = vector.broadcast %19 : vector<8x1xf32> to vector<8x8xf32>
    %23 = arith.subf %14, %22 : vector<8x8xf32>
    %24 = math.exp %23 : vector<8x8xf32>
    %c0_16 = arith.constant 0 : index
    %c0_17 = arith.constant 0 : index
    %c0_18 = arith.constant 0 : index
    %25 = vector.load %arg12[%c0_16, %c0_17, %c0_18] : memref<4x8x1xf32, #tpu.memory_space<vmem>>, vector<1x8x1xf32>
    %26 = vector.shape_cast %25 : vector<1x8x1xf32> to vector<8x1xf32>
    %27 = arith.mulf %21, %26 : vector<8x1xf32>
    %cst_19 = arith.constant dense<0.000000e+00> : vector<8xf32>
    %28 = vector.multi_reduction <add>, %24, %cst_19 [1] : vector<8x8xf32> to vector<8xf32>
    %29 = vector.shape_cast %28 : vector<8xf32> to vector<8x1xf32>
    %30 = arith.addf %27, %29 : vector<8x1xf32>
    %c0_20 = arith.constant 0 : index
    %c0_21 = arith.constant 0 : index
    %c0_22 = arith.constant 0 : index
    %31 = vector.load %arg12[%c0_20, %c0_21, %c0_22] : memref<4x8x1xf32, #tpu.memory_space<vmem>>, vector<1x8x1xf32>
    %32 = vector.shape_cast %31 : vector<1x8x1xf32> to vector<8x1xf32>
    %33 = vector.shape_cast %30 : vector<8x1xf32> to vector<1x8x1xf32>
    tpu.vector_store %arg12[%c0_20, %c0_21, %c0_22], %33 {strides = array<i32>} : memref<4x8x1xf32, #tpu.memory_space<vmem>>, vector<1x8x1xf32>,
    %c0_23 = arith.constant 0 : index
    %c0_24 = arith.constant 0 : index
    %c0_25 = arith.constant 0 : index
    %34 = vector.load %arg13[%c0_23, %c0_24, %c0_25] : memref<4x8x32xf32, #tpu.memory_space<vmem>>, vector<1x8x32xf32>
    %35 = vector.shape_cast %34 : vector<1x8x32xf32> to vector<8x32xf32>
    %36 = vector.broadcast %21 : vector<8x1xf32> to vector<8x32xf32>
    %37 = arith.mulf %36, %35 : vector<8x32xf32>
    %cst_26 = arith.constant dense<0.000000e+00> : vector<8x32xf32>
    %38 = tpu.matmul %24, %11, %cst_26 {dimension_numbers = #tpu.dot_dimension_numbers<[1], [0], [0], [1], [0, 0, 1, 1], [], []>} : vector<8x8xf32>, vector<8x32xf32>, vector<8x32xf32> -> vector<8x32xf32>
    %39 = arith.addf %37, %38 : vector<8x32xf32>
    %c0_27 = arith.constant 0 : index
    %c0_28 = arith.constant 0 : index
    %c0_29 = arith.constant 0 : index
    %40 = vector.load %arg13[%c0_27, %c0_28, %c0_29] : memref<4x8x32xf32, #tpu.memory_space<vmem>>, vector<1x8x32xf32>
    %41 = vector.shape_cast %40 : vector<1x8x32xf32> to vector<8x32xf32>
    %42 = vector.shape_cast %39 : vector<8x32xf32> to vector<1x8x32xf32>
    tpu.vector_store %arg13[%c0_27, %c0_28, %c0_29], %42 {strides = array<i32>} : memref<4x8x32xf32, #tpu.memory_space<vmem>>, vector<1x8x32xf32>,
    %c0_30 = arith.constant 0 : index
    %c0_31 = arith.constant 0 : index
    %c0_32 = arith.constant 0 : index
    %43 = vector.load %arg11[%c0_30, %c0_31, %c0_32] : memref<4x8x1xf32, #tpu.memory_space<vmem>>, vector<1x8x1xf32>
    %44 = vector.shape_cast %43 : vector<1x8x1xf32> to vector<8x1xf32>
    %45 = vector.shape_cast %19 : vector<8x1xf32> to vector<1x8x1xf32>
    tpu.vector_store %arg11[%c0_30, %c0_31, %c0_32], %45 {strides = array<i32>} : memref<4x8x1xf32, #tpu.memory_space<vmem>>, vector<1x8x1xf32>,
    %c0_33 = arith.constant 0 : index
    %c16 = arith.constant 16 : index
    %46 = vector.load %arg10[%c0_33, %c16] : memref<8x64xf32, #tpu.memory_space<vmem>>, vector<8x16xf32>
    %47 = vector.extract_strided_slice %6 {offsets = [0, 16], sizes = [8, 16], strides = [1, 1]} : vector<8x64xf32> to vector<8x16xf32>
    %48 = vector.extract_strided_slice %8 {offsets = [0, 32], sizes = [8, 32], strides = [1, 1]} : vector<8x128xf32> to vector<8x32xf32>
    %cst_34 = arith.constant dense<0.000000e+00> : vector<8x8xf32>
    %49 = tpu.matmul %46, %47, %cst_34 {dimension_numbers = #tpu.dot_dimension_numbers<[1], [1], [0], [0], [0, 0, 1, 0], [], []>} : vector<8x16xf32>, vector<8x16xf32>, vector<8x8xf32> -> vector<8x8xf32>
    %cst_35 = arith.constant 2.500000e-01 : f32
    %50 = vector.broadcast %cst_35 : f32 to vector<8x8xf32>
    %51 = arith.mulf %49, %50 : vector<8x8xf32>
    %c1 = arith.constant 1 : index
    %c0_36 = arith.constant 0 : index
    %c0_37 = arith.constant 0 : index
    %52 = vector.load %arg11[%c1, %c0_36, %c0_37] : memref<4x8x1xf32, #tpu.memory_space<vmem>>, vector<1x8x1xf32>
    %53 = vector.shape_cast %52 : vector<1x8x1xf32> to vector<8x1xf32>
    %cst_38 = arith.constant dense<0xFF800000> : vector<8xf32>
    %54 = vector.multi_reduction <maximumf>, %51, %cst_38 [1] : vector<8x8xf32> to vector<8xf32>
    %55 = vector.shape_cast %54 : vector<8xf32> to vector<8x1xf32>
    %56 = arith.maximumf %53, %55 : vector<8x1xf32>
    %57 = arith.subf %53, %56 : vector<8x1xf32>
    %58 = math.exp %57 : vector<8x1xf32>
    %59 = vector.broadcast %56 : vector<8x1xf32> to vector<8x8xf32>
    %60 = arith.subf %51, %59 : vector<8x8xf32>
    %61 = math.exp %60 : vector<8x8xf32>
    %c1_39 = arith.constant 1 : index
    %c0_40 = arith.constant 0 : index
    %c0_41 = arith.constant 0 : index
    %62 = vector.load %arg12[%c1_39, %c0_40, %c0_41] : memref<4x8x1xf32, #tpu.memory_space<vmem>>, vector<1x8x1xf32>
    %63 = vector.shape_cast %62 : vector<1x8x1xf32> to vector<8x1xf32>
    %64 = arith.mulf %58, %63 : vector<8x1xf32>
    %cst_42 = arith.constant dense<0.000000e+00> : vector<8xf32>
    %65 = vector.multi_reduction <add>, %61, %cst_42 [1] : vector<8x8xf32> to vector<8xf32>
    %66 = vector.shape_cast %65 : vector<8xf32> to vector<8x1xf32>
    %67 = arith.addf %64, %66 : vector<8x1xf32>
    %c1_43 = arith.constant 1 : index
    %c0_44 = arith.constant 0 : index
    %c0_45 = arith.constant 0 : index
    %68 = vector.load %arg12[%c1_43, %c0_44, %c0_45] : memref<4x8x1xf32, #tpu.memory_space<vmem>>, vector<1x8x1xf32>
    %69 = vector.shape_cast %68 : vector<1x8x1xf32> to vector<8x1xf32>
    %70 = vector.shape_cast %67 : vector<8x1xf32> to vector<1x8x1xf32>
    tpu.vector_store %arg12[%c1_43, %c0_44, %c0_45], %70 {strides = array<i32>} : memref<4x8x1xf32, #tpu.memory_space<vmem>>, vector<1x8x1xf32>,
    %c1_46 = arith.constant 1 : index
    %c0_47 = arith.constant 0 : index
    %c0_48 = arith.constant 0 : index
    %71 = vector.load %arg13[%c1_46, %c0_47, %c0_48] : memref<4x8x32xf32, #tpu.memory_space<vmem>>, vector<1x8x32xf32>
    %72 = vector.shape_cast %71 : vector<1x8x32xf32> to vector<8x32xf32>
    %73 = vector.broadcast %58 : vector<8x1xf32> to vector<8x32xf32>
    %74 = arith.mulf %73, %72 : vector<8x32xf32>
    %cst_49 = arith.constant dense<0.000000e+00> : vector<8x32xf32>
    %75 = tpu.matmul %61, %48, %cst_49 {dimension_numbers = #tpu.dot_dimension_numbers<[1], [0], [0], [1], [0, 0, 1, 1], [], []>} : vector<8x8xf32>, vector<8x32xf32>, vector<8x32xf32> -> vector<8x32xf32>
    %76 = arith.addf %74, %75 : vector<8x32xf32>
    %c1_50 = arith.constant 1 : index
    %c0_51 = arith.constant 0 : index
    %c0_52 = arith.constant 0 : index
    %77 = vector.load %arg13[%c1_50, %c0_51, %c0_52] : memref<4x8x32xf32, #tpu.memory_space<vmem>>, vector<1x8x32xf32>
    %78 = vector.shape_cast %77 : vector<1x8x32xf32> to vector<8x32xf32>
    %79 = vector.shape_cast %76 : vector<8x32xf32> to vector<1x8x32xf32>
    tpu.vector_store %arg13[%c1_50, %c0_51, %c0_52], %79 {strides = array<i32>} : memref<4x8x32xf32, #tpu.memory_space<vmem>>, vector<1x8x32xf32>,
    %c1_53 = arith.constant 1 : index
    %c0_54 = arith.constant 0 : index
    %c0_55 = arith.constant 0 : index
    %80 = vector.load %arg11[%c1_53, %c0_54, %c0_55] : memref<4x8x1xf32, #tpu.memory_space<vmem>>, vector<1x8x1xf32>
    %81 = vector.shape_cast %80 : vector<1x8x1xf32> to vector<8x1xf32>
    %82 = vector.shape_cast %56 : vector<8x1xf32> to vector<1x8x1xf32>
    tpu.vector_store %arg11[%c1_53, %c0_54, %c0_55], %82 {strides = array<i32>} : memref<4x8x1xf32, #tpu.memory_space<vmem>>, vector<1x8x1xf32>,
    %c0_56 = arith.constant 0 : index
    %c32 = arith.constant 32 : index
    %83 = vector.load %arg10[%c0_56, %c32] : memref<8x64xf32, #tpu.memory_space<vmem>>, vector<8x16xf32>
    %84 = vector.extract_strided_slice %6 {offsets = [0, 32], sizes = [8, 16], strides = [1, 1]} : vector<8x64xf32> to vector<8x16xf32>
    %85 = vector.extract_strided_slice %8 {offsets = [0, 64], sizes = [8, 32], strides = [1, 1]} : vector<8x128xf32> to vector<8x32xf32>
    %cst_57 = arith.constant dense<0.000000e+00> : vector<8x8xf32>
    %86 = tpu.matmul %83, %84, %cst_57 {dimension_numbers = #tpu.dot_dimension_numbers<[1], [1], [0], [0], [0, 0, 1, 0], [], []>} : vector<8x16xf32>, vector<8x16xf32>, vector<8x8xf32> -> vector<8x8xf32>
    %cst_58 = arith.constant 2.500000e-01 : f32
    %87 = vector.broadcast %cst_58 : f32 to vector<8x8xf32>
    %88 = arith.mulf %86, %87 : vector<8x8xf32>
    %c2 = arith.constant 2 : index
    %c0_59 = arith.constant 0 : index
    %c0_60 = arith.constant 0 : index
    %89 = vector.load %arg11[%c2, %c0_59, %c0_60] : memref<4x8x1xf32, #tpu.memory_space<vmem>>, vector<1x8x1xf32>
    %90 = vector.shape_cast %89 : vector<1x8x1xf32> to vector<8x1xf32>
    %cst_61 = arith.constant dense<0xFF800000> : vector<8xf32>
    %91 = vector.multi_reduction <maximumf>, %88, %cst_61 [1] : vector<8x8xf32> to vector<8xf32>
    %92 = vector.shape_cast %91 : vector<8xf32> to vector<8x1xf32>
    %93 = arith.maximumf %90, %92 : vector<8x1xf32>
    %94 = arith.subf %90, %93 : vector<8x1xf32>
    %95 = math.exp %94 : vector<8x1xf32>
    %96 = vector.broadcast %93 : vector<8x1xf32> to vector<8x8xf32>
    %97 = arith.subf %88, %96 : vector<8x8xf32>
    %98 = math.exp %97 : vector<8x8xf32>
    %c2_62 = arith.constant 2 : index
    %c0_63 = arith.constant 0 : index
    %c0_64 = arith.constant 0 : index
    %99 = vector.load %arg12[%c2_62, %c0_63, %c0_64] : memref<4x8x1xf32, #tpu.memory_space<vmem>>, vector<1x8x1xf32>
    %100 = vector.shape_cast %99 : vector<1x8x1xf32> to vector<8x1xf32>
    %101 = arith.mulf %95, %100 : vector<8x1xf32>
    %cst_65 = arith.constant dense<0.000000e+00> : vector<8xf32>
    %102 = vector.multi_reduction <add>, %98, %cst_65 [1] : vector<8x8xf32> to vector<8xf32>
    %103 = vector.shape_cast %102 : vector<8xf32> to vector<8x1xf32>
    %104 = arith.addf %101, %103 : vector<8x1xf32>
    %c2_66 = arith.constant 2 : index
    %c0_67 = arith.constant 0 : index
    %c0_68 = arith.constant 0 : index
    %105 = vector.load %arg12[%c2_66, %c0_67, %c0_68] : memref<4x8x1xf32, #tpu.memory_space<vmem>>, vector<1x8x1xf32>
    %106 = vector.shape_cast %105 : vector<1x8x1xf32> to vector<8x1xf32>
    %107 = vector.shape_cast %104 : vector<8x1xf32> to vector<1x8x1xf32>
    tpu.vector_store %arg12[%c2_66, %c0_67, %c0_68], %107 {strides = array<i32>} : memref<4x8x1xf32, #tpu.memory_space<vmem>>, vector<1x8x1xf32>,
    %c2_69 = arith.constant 2 : index
    %c0_70 = arith.constant 0 : index
    %c0_71 = arith.constant 0 : index
    %108 = vector.load %arg13[%c2_69, %c0_70, %c0_71] : memref<4x8x32xf32, #tpu.memory_space<vmem>>, vector<1x8x32xf32>
    %109 = vector.shape_cast %108 : vector<1x8x32xf32> to vector<8x32xf32>
    %110 = vector.broadcast %95 : vector<8x1xf32> to vector<8x32xf32>
    %111 = arith.mulf %110, %109 : vector<8x32xf32>
    %cst_72 = arith.constant dense<0.000000e+00> : vector<8x32xf32>
    %112 = tpu.matmul %98, %85, %cst_72 {dimension_numbers = #tpu.dot_dimension_numbers<[1], [0], [0], [1], [0, 0, 1, 1], [], []>} : vector<8x8xf32>, vector<8x32xf32>, vector<8x32xf32> -> vector<8x32xf32>
    %113 = arith.addf %111, %112 : vector<8x32xf32>
    %c2_73 = arith.constant 2 : index
    %c0_74 = arith.constant 0 : index
    %c0_75 = arith.constant 0 : index
    %114 = vector.load %arg13[%c2_73, %c0_74, %c0_75] : memref<4x8x32xf32, #tpu.memory_space<vmem>>, vector<1x8x32xf32>
    %115 = vector.shape_cast %114 : vector<1x8x32xf32> to vector<8x32xf32>
    %116 = vector.shape_cast %113 : vector<8x32xf32> to vector<1x8x32xf32>
    tpu.vector_store %arg13[%c2_73, %c0_74, %c0_75], %116 {strides = array<i32>} : memref<4x8x32xf32, #tpu.memory_space<vmem>>, vector<1x8x32xf32>,
    %c2_76 = arith.constant 2 : index
    %c0_77 = arith.constant 0 : index
    %c0_78 = arith.constant 0 : index
    %117 = vector.load %arg11[%c2_76, %c0_77, %c0_78] : memref<4x8x1xf32, #tpu.memory_space<vmem>>, vector<1x8x1xf32>
    %118 = vector.shape_cast %117 : vector<1x8x1xf32> to vector<8x1xf32>
    %119 = vector.shape_cast %93 : vector<8x1xf32> to vector<1x8x1xf32>
    tpu.vector_store %arg11[%c2_76, %c0_77, %c0_78], %119 {strides = array<i32>} : memref<4x8x1xf32, #tpu.memory_space<vmem>>, vector<1x8x1xf32>,
    %c0_79 = arith.constant 0 : index
    %c48 = arith.constant 48 : index
    %120 = vector.load %arg10[%c0_79, %c48] : memref<8x64xf32, #tpu.memory_space<vmem>>, vector<8x16xf32>
    %121 = vector.extract_strided_slice %6 {offsets = [0, 48], sizes = [8, 16], strides = [1, 1]} : vector<8x64xf32> to vector<8x16xf32>
    %122 = vector.extract_strided_slice %8 {offsets = [0, 96], sizes = [8, 32], strides = [1, 1]} : vector<8x128xf32> to vector<8x32xf32>
    %cst_80 = arith.constant dense<0.000000e+00> : vector<8x8xf32>
    %123 = tpu.matmul %120, %121, %cst_80 {dimension_numbers = #tpu.dot_dimension_numbers<[1], [1], [0], [0], [0, 0, 1, 0], [], []>} : vector<8x16xf32>, vector<8x16xf32>, vector<8x8xf32> -> vector<8x8xf32>
    %cst_81 = arith.constant 2.500000e-01 : f32
    %124 = vector.broadcast %cst_81 : f32 to vector<8x8xf32>
    %125 = arith.mulf %123, %124 : vector<8x8xf32>
    %c3 = arith.constant 3 : index
    %c0_82 = arith.constant 0 : index
    %c0_83 = arith.constant 0 : index
    %126 = vector.load %arg11[%c3, %c0_82, %c0_83] : memref<4x8x1xf32, #tpu.memory_space<vmem>>, vector<1x8x1xf32>
    %127 = vector.shape_cast %126 : vector<1x8x1xf32> to vector<8x1xf32>
    %cst_84 = arith.constant dense<0xFF800000> : vector<8xf32>
    %128 = vector.multi_reduction <maximumf>, %125, %cst_84 [1] : vector<8x8xf32> to vector<8xf32>
    %129 = vector.shape_cast %128 : vector<8xf32> to vector<8x1xf32>
    %130 = arith.maximumf %127, %129 : vector<8x1xf32>
    %131 = arith.subf %127, %130 : vector<8x1xf32>
    %132 = math.exp %131 : vector<8x1xf32>
    %133 = vector.broadcast %130 : vector<8x1xf32> to vector<8x8xf32>
    %134 = arith.subf %125, %133 : vector<8x8xf32>
    %135 = math.exp %134 : vector<8x8xf32>
    %c3_85 = arith.constant 3 : index
    %c0_86 = arith.constant 0 : index
    %c0_87 = arith.constant 0 : index
    %136 = vector.load %arg12[%c3_85, %c0_86, %c0_87] : memref<4x8x1xf32, #tpu.memory_space<vmem>>, vector<1x8x1xf32>
    %137 = vector.shape_cast %136 : vector<1x8x1xf32> to vector<8x1xf32>
    %138 = arith.mulf %132, %137 : vector<8x1xf32>
    %cst_88 = arith.constant dense<0.000000e+00> : vector<8xf32>
    %139 = vector.multi_reduction <add>, %135, %cst_88 [1] : vector<8x8xf32> to vector<8xf32>
    %140 = vector.shape_cast %139 : vector<8xf32> to vector<8x1xf32>
    %141 = arith.addf %138, %140 : vector<8x1xf32>
    %c3_89 = arith.constant 3 : index
    %c0_90 = arith.constant 0 : index
    %c0_91 = arith.constant 0 : index
    %142 = vector.load %arg12[%c3_89, %c0_90, %c0_91] : memref<4x8x1xf32, #tpu.memory_space<vmem>>, vector<1x8x1xf32>
    %143 = vector.shape_cast %142 : vector<1x8x1xf32> to vector<8x1xf32>
    %144 = vector.shape_cast %141 : vector<8x1xf32> to vector<1x8x1xf32>
    tpu.vector_store %arg12[%c3_89, %c0_90, %c0_91], %144 {strides = array<i32>} : memref<4x8x1xf32, #tpu.memory_space<vmem>>, vector<1x8x1xf32>,
    %c3_92 = arith.constant 3 : index
    %c0_93 = arith.constant 0 : index
    %c0_94 = arith.constant 0 : index
    %145 = vector.load %arg13[%c3_92, %c0_93, %c0_94] : memref<4x8x32xf32, #tpu.memory_space<vmem>>, vector<1x8x32xf32>
    %146 = vector.shape_cast %145 : vector<1x8x32xf32> to vector<8x32xf32>
    %147 = vector.broadcast %132 : vector<8x1xf32> to vector<8x32xf32>
    %148 = arith.mulf %147, %146 : vector<8x32xf32>
    %cst_95 = arith.constant dense<0.000000e+00> : vector<8x32xf32>
    %149 = tpu.matmul %135, %122, %cst_95 {dimension_numbers = #tpu.dot_dimension_numbers<[1], [0], [0], [1], [0, 0, 1, 1], [], []>} : vector<8x8xf32>, vector<8x32xf32>, vector<8x32xf32> -> vector<8x32xf32>
    %150 = arith.addf %148, %149 : vector<8x32xf32>
    %c3_96 = arith.constant 3 : index
    %c0_97 = arith.constant 0 : index
    %c0_98 = arith.constant 0 : index
    %151 = vector.load %arg13[%c3_96, %c0_97, %c0_98] : memref<4x8x32xf32, #tpu.memory_space<vmem>>, vector<1x8x32xf32>
    %152 = vector.shape_cast %151 : vector<1x8x32xf32> to vector<8x32xf32>
    %153 = vector.shape_cast %150 : vector<8x32xf32> to vector<1x8x32xf32>
    tpu.vector_store %arg13[%c3_96, %c0_97, %c0_98], %153 {strides = array<i32>} : memref<4x8x32xf32, #tpu.memory_space<vmem>>, vector<1x8x32xf32>,
    %c3_99 = arith.constant 3 : index
    %c0_100 = arith.constant 0 : index
    %c0_101 = arith.constant 0 : index
    %154 = vector.load %arg11[%c3_99, %c0_100, %c0_101] : memref<4x8x1xf32, #tpu.memory_space<vmem>>, vector<1x8x1xf32>
    %155 = vector.shape_cast %154 : vector<1x8x1xf32> to vector<8x1xf32>
    %156 = vector.shape_cast %130 : vector<8x1xf32> to vector<1x8x1xf32>
    tpu.vector_store %arg11[%c3_99, %c0_100, %c0_101], %156 {strides = array<i32>} : memref<4x8x1xf32, #tpu.memory_space<vmem>>, vector<1x8x1xf32>,
    %c0_i32_102 = arith.constant 0 : i32
    %157 = arith.cmpi eq, %arg2, %c0_i32_102 : i32
    %158 = arith.extui %157 : i1 to i32
    %c0_i32_103 = arith.constant 0 : i32
    %159 = arith.cmpi ne, %158, %c0_i32_103 : i32
    scf.if %159 {
      %c0_104 = arith.constant 0 : index
      %c0_105 = arith.constant 0 : index
      %c0_106 = arith.constant 0 : index
      %160 = vector.load %arg12[%c0_104, %c0_105, %c0_106] : memref<4x8x1xf32, #tpu.memory_space<vmem>>, vector<1x8x1xf32>
      %161 = vector.shape_cast %160 : vector<1x8x1xf32> to vector<8x1xf32>
      %162 = tpu.reciprocal %161 {approx = true} : vector<8x1xf32> -> vector<8x1xf32>
      %c0_107 = arith.constant 0 : index
      %c0_108 = arith.constant 0 : index
      %c0_109 = arith.constant 0 : index
      %163 = vector.load %arg13[%c0_107, %c0_108, %c0_109] : memref<4x8x32xf32, #tpu.memory_space<vmem>>, vector<1x8x32xf32>
      %164 = vector.shape_cast %163 : vector<1x8x32xf32> to vector<8x32xf32>
      %165 = vector.broadcast %162 : vector<8x1xf32> to vector<8x32xf32>
      %166 = arith.mulf %164, %165 : vector<8x32xf32>
      %c1_110 = arith.constant 1 : index
      %c0_111 = arith.constant 0 : index
      %c0_112 = arith.constant 0 : index
      %167 = vector.load %arg12[%c1_110, %c0_111, %c0_112] : memref<4x8x1xf32, #tpu.memory_space<vmem>>, vector<1x8x1xf32>
      %168 = vector.shape_cast %167 : vector<1x8x1xf32> to vector<8x1xf32>
      %169 = tpu.reciprocal %168 {approx = true} : vector<8x1xf32> -> vector<8x1xf32>
      %c1_113 = arith.constant 1 : index
      %c0_114 = arith.constant 0 : index
      %c0_115 = arith.constant 0 : index
      %170 = vector.load %arg13[%c1_113, %c0_114, %c0_115] : memref<4x8x32xf32, #tpu.memory_space<vmem>>, vector<1x8x32xf32>
      %171 = vector.shape_cast %170 : vector<1x8x32xf32> to vector<8x32xf32>
      %172 = vector.broadcast %169 : vector<8x1xf32> to vector<8x32xf32>
      %173 = arith.mulf %171, %172 : vector<8x32xf32>
      %c2_116 = arith.constant 2 : index
      %c0_117 = arith.constant 0 : index
      %c0_118 = arith.constant 0 : index
      %174 = vector.load %arg12[%c2_116, %c0_117, %c0_118] : memref<4x8x1xf32, #tpu.memory_space<vmem>>, vector<1x8x1xf32>
      %175 = vector.shape_cast %174 : vector<1x8x1xf32> to vector<8x1xf32>
      %176 = tpu.reciprocal %175 {approx = true} : vector<8x1xf32> -> vector<8x1xf32>
      %c2_119 = arith.constant 2 : index
      %c0_120 = arith.constant 0 : index
      %c0_121 = arith.constant 0 : index
      %177 = vector.load %arg13[%c2_119, %c0_120, %c0_121] : memref<4x8x32xf32, #tpu.memory_space<vmem>>, vector<1x8x32xf32>
      %178 = vector.shape_cast %177 : vector<1x8x32xf32> to vector<8x32xf32>
      %179 = vector.broadcast %176 : vector<8x1xf32> to vector<8x32xf32>
      %180 = arith.mulf %178, %179 : vector<8x32xf32>
      %c3_122 = arith.constant 3 : index
      %c0_123 = arith.constant 0 : index
      %c0_124 = arith.constant 0 : index
      %181 = vector.load %arg12[%c3_122, %c0_123, %c0_124] : memref<4x8x1xf32, #tpu.memory_space<vmem>>, vector<1x8x1xf32>
      %182 = vector.shape_cast %181 : vector<1x8x1xf32> to vector<8x1xf32>
      %183 = tpu.reciprocal %182 {approx = true} : vector<8x1xf32> -> vector<8x1xf32>
      %c3_125 = arith.constant 3 : index
      %c0_126 = arith.constant 0 : index
      %c0_127 = arith.constant 0 : index
      %184 = vector.load %arg13[%c3_125, %c0_126, %c0_127] : memref<4x8x32xf32, #tpu.memory_space<vmem>>, vector<1x8x32xf32>
      %185 = vector.shape_cast %184 : vector<1x8x32xf32> to vector<8x32xf32>
      %186 = vector.broadcast %183 : vector<8x1xf32> to vector<8x32xf32>
      %187 = arith.mulf %185, %186 : vector<8x32xf32>
      %188 = tpu.concatenate %166, %173, %180, %187 in 1 : vector<8x32xf32>, vector<8x32xf32>, vector<8x32xf32>, vector<8x32xf32> -> vector<8x128xf32>
      %c0_128 = arith.constant 0 : index
      %c0_129 = arith.constant 0 : index
      %189 = vector.load %arg8[%c0_128, %c0_129] : memref<128x32xf32, #tpu.memory_space<vmem>>, vector<128x32xf32>
      %cst_130 = arith.constant dense<0.000000e+00> : vector<8x32xf32>
      %190 = tpu.matmul %188, %189, %cst_130 {dimension_numbers = #tpu.dot_dimension_numbers<[1], [0], [0], [1], [0, 0, 1, 1], [], []>} : vector<8x128xf32>, vector<128x32xf32>, vector<8x32xf32> -> vector<8x32xf32>
      %c0_131 = arith.constant 0 : index
      %c0_132 = arith.constant 0 : index
      %c0_133 = arith.constant 0 : index
      %191 = vector.load %arg9[%c0_131, %c0_132, %c0_133] : memref<1x8x32xf32, #tpu.memory_space<vmem>>, vector<1x8x32xf32>
      %192 = vector.shape_cast %191 : vector<1x8x32xf32> to vector<8x32xf32>
      %193 = vector.shape_cast %190 : vector<8x32xf32> to vector<1x8x32xf32>
      tpu.vector_store %arg9[%c0_131, %c0_132, %c0_133], %193 {strides = array<i32>} : memref<1x8x32xf32, #tpu.memory_space<vmem>>, vector<1x8x32xf32>,
    } else {
    }
    return
  }
  func.func @transform_0(%arg0: i32, %arg1: i32, %arg2: i32) -> (i32, i32, i32) {
    %c0_i32 = arith.constant 0 : i32
    %c0_i32_0 = arith.constant 0 : i32
    return %arg0, %arg1, %c0_i32 : i32, i32, i32
  }
  func.func @transform_1(%arg0: i32, %arg1: i32, %arg2: i32) -> (i32, i32, i32) {
    %c0_i32 = arith.constant 0 : i32
    %c0_i32_0 = arith.constant 0 : i32
    return %arg0, %arg2, %c0_i32 : i32, i32, i32
  }
  func.func @transform_2(%arg0: i32, %arg1: i32, %arg2: i32) -> (i32, i32) {
    %c0_i32 = arith.constant 0 : i32
    %c0_i32_0 = arith.constant 0 : i32
    %c0_i32_1 = arith.constant 0 : i32
    return %c0_i32, %c0_i32_0 : i32, i32
  }
  func.func @transform_3(%arg0: i32, %arg1: i32, %arg2: i32) -> (i32, i32) {
    %c0_i32 = arith.constant 0 : i32
    %c0_i32_0 = arith.constant 0 : i32
    %c0_i32_1 = arith.constant 0 : i32
    return %c0_i32, %c0_i32_0 : i32, i32
  }
  func.func @transform_4(%arg0: i32, %arg1: i32, %arg2: i32) -> (i32, i32) {
    %c0_i32 = arith.constant 0 : i32
    %c0_i32_0 = arith.constant 0 : i32
    %c0_i32_1 = arith.constant 0 : i32
    return %c0_i32, %c0_i32_0 : i32, i32
  }
  func.func @transform_5(%arg0: i32, %arg1: i32, %arg2: i32) -> (i32, i32) {
    %c0_i32 = arith.constant 0 : i32
    %c0_i32_0 = arith.constant 0 : i32
    %c0_i32_1 = arith.constant 0 : i32
    return %c0_i32, %c0_i32_0 : i32, i32
  }
  func.func @transform_6(%arg0: i32, %arg1: i32, %arg2: i32) -> (i32, i32, i32) {
    %c0_i32 = arith.constant 0 : i32
    %c0_i32_0 = arith.constant 0 : i32
    return %arg0, %arg1, %c0_i32 : i32, i32, i32
  }
}

</mosaic_0001>

<bundles_post_ra>
// kernel: tpu_custom_call.1
= control target key start
LH: loop header
LB: loop body
LE: loop exit
PB: predicated region body
PF: predicated region fallthrough
CT: control target
= control target key end

     0   :  { %11 = vsyncpa [#allocation7], 0  ;;  %s2318_s0 = inlined_call_operand.vmem [shape: f32[2,8,32], index: 0, kind: input, shape index: {}]   ;;  %s2319_s1 = inlined_call_operand.vmem [shape: f32[2,8,32], index: 1, kind: input, shape index: {}]   ;;  %s2320_s2 = inlined_call_operand.vmem [shape: f32[32,64], index: 2, kind: input, shape index: {}]   ;;  %s2321_s3 = inlined_call_operand.vmem [shape: f32[32,64], index: 3, kind: input, shape index: {}]   ;;  %s2322_s4 = inlined_call_operand.vmem [shape: f32[32,128], index: 4, kind: input, shape index: {}]   ;;  %s2323_s5 = inlined_call_operand.vmem [shape: f32[128,32], index: 5, kind: input, shape index: {}]   ;;  %s2324_s6 = inlined_call_operand.hbm [shape: f32[2,8,32], index: 6, kind: output, shape index: {}]  }
   0x1   :  { %13 = vsyncpa [#allocation7 + $0x1], 0  ;;  %s1968_s21 = smov 0   ;;  %s1970_s22 = smov 0  }
   0x2   :  { %s1972_s23 = smov 0   ;;  %s1974_s24 = smov 0  }
   0x3   :  { %s1976_s25 = smov 0   ;;  %s1978_s26 = smov 0  }
   0x4 LB: > { %s1572_s27 = sadd.s32 4294967295, %s1921_s26   ;;  %s1573_s28 = sadd.s32 4294967294, %s1921_s26   ;;  %s1921_s26 = sphi %s1978_s26, %s19_s26   ;;  %s1917_s25 = sphi %s1976_s25, %s2331_s25   ;;  %s1913_s24 = sphi %s1974_s24, %s2330_s24   ;;  %s1909_s23 = sphi %s1972_s23, %s2329_s23   ;;  %s1905_s22 = sphi %s1970_s22, %s2328_s22   ;;  %s1901_s21 = sphi %s1968_s21, %s2327_s21  }
   0x5   : > { %s38_s29 = sadd.s32 1, %s1917_s25  ;;  %s187_s30 = sadd.s32 1, %s1909_s23 }
   0x6   : > { %p40_p0 = scmp.ge.s32.totalorder %s38_s29, 2  ;;  %p197_p1 = scmp.ne.s32.totalorder %s1909_s23, %s1905_s22 }
   0x7   : > { %p198_p2 = scmp.eq.s32.totalorder %s1572_s27, 1  ;;  %p203_p3 = scmp.ne.s32.totalorder %s1905_s22, %s1901_s21 }
   0x8   : > { %s2333_s29 = smov (%p40_p0, %s38_s29), 0  ;;  %p204_p5 = scmp.eq.s32.totalorder %s1573_s28, 1 }
   0x9   : > { %p2008_p4 = por %p198_p2, %p197_p1  ;;  %s182_s8 = ssub.s32 %s1917_s25, %s2333_s29 }
   0xa   : > { %p1576_p6 = scmp.ge.s32.totalorder %s1921_s26, 1  ;;  %p185_p7 = scmp.eq.s32.totalorder %s182_s8, 0 }
   0xb   : > { %p2015_p8 = por %p204_p5, %p203_p3  ;;  %p254_p9 = scmp.lt.s32.totalorder %s1921_s26, 3 }
   0xc   : > { %s2021_s10 = scalar_select %p185_p7, %s1909_s23, %s187_s30  }
   0xd   : > { %p255_p10 = pnand %p1576_p6, %p254_p9 }
   0xe   : > { %p293_p11 = scmp.lt.s32.totalorder (!%p255_p10), %s1913_s24, 1  ;;  %s1927_s17 = smov (!%p255_p10), 80  }
   0xf   : > { %258 = sbr.rel (%p255_p10) target bundleno = 1448 (0x5a8), region = 44  ;;  %s1930_s19 = smov (!%p255_p10), 64  }
  0x10   : > { %s1931_s20 = smov (!%p255_p10), 32  }
  0x14   : > { %v315_v0 = vld [vmem:[%s2320_s2 + $0x18] sm:$0xff]  ;;  %v1923_v1 = vmov 0.0   ;;  %v314_v2 = vld [vmem:[%s2320_s2 + $0x10] sm:$0xff]  ;;  %vm1924_vm0 = vmmov 0   ;;  %vm316_vm1 = vcmask 261120   ;;  %s294_s15 = scalar_select %p293_p11, %s1913_s24, 1 }
  0x15   : > { %1647 = vmatprep.subr.mxu1 %v1923_v1  ;;  %1655 = vmatprep.mubr.msk.f32.mxu1 %vm1924_vm0, %v1923_v1  ;;  %401 = vst.msk [vmem:[#allocation5] sm:$0xff] %vm316_vm1, %v1923_v1  ;;  %402 = vst.msk [vmem:[#allocation5 + $0x8] sm:$0xff] %vm316_vm1, %v1923_v1  ;;  %v313_v3 = vld [vmem:[%s2320_s2 + $0x8] sm:$0xff]  ;;  %v312_v4 = vld [vmem:[%s2320_s2] sm:$0xff]  ;;  %vm390_vm2 = vcmask 523264   ;;  %vm559_vm3 = vcmask 130048  }
  0x16   : > { %1648 = vmatpush3.msra.mxu1 %v315_v0  ;;  %403 = vst.msk [vmem:[#allocation5 + $0x10] sm:$0xff] %vm316_vm1, %v1923_v1  ;;  %404 = vst.msk [vmem:[#allocation5 + $0x18] sm:$0xff] %vm316_vm1, %v1923_v1  ;;  %1690 = vmatprep.subr.mxu0 %v1923_v1  ;;  %s1578_s18 = sshll.u32 %s294_s15, 3  ;;  %v409_v6 = vld [vmem:[%s2321_s3 + $0x18] sm:$0xff]  ;;  %v408_v7 = vld [vmem:[%s2321_s3 + $0x10] sm:$0xff]  ;;  %s1925_s15 = smov 96  }
  0x17   : > { %1649 = vmatprep.subr.mxu1 %v1923_v1  ;;  %1692 = vmatprep.mubr.msk.f32.mxu0 %vm1924_vm0, %v1923_v1  ;;  %s299_s30 = scalar_lea.vmem %s2318_s0, %s1578_s18  ;;  %s306_s16 = scalar_lea.vmem %s2319_s1, %s1578_s18  ;;  %v407_v8 = vld [vmem:[%s2321_s3 + $0x8] sm:$0xff]  ;;  %v406_v9 = vld [vmem:[%s2321_s3] sm:$0xff]  ;;  %v487_v11 = vld [vmem:[%s2322_s4 + $0x18] sm:$0xff]  ;;  %vm638_vm4 = vcmask 64512   ;;  %vm392_vm5 = vcmask 7168   ;;  %v1928_v30 = vmov -inf  }
  0x18   : > { %1650 = vmatpush3.msra.mxu1 %v314_v2  ;;  %v311_v5 = vld [vmem:[%s299_s30] sm:$0xff]  ;;  %v486_v12 = vld [vmem:[%s2322_s4 + $0x10] sm:$0xff]  ;;  %v485_v13 = vld [vmem:[%s2322_s4 + $0x8] sm:$0xff]  ;;  %393 = vst.msk [vmem:[#allocation3] sm:$0xff] %vm392_vm5, %v1928_v30  ;;  %v1929_v33 = vmov 0   ;;  %vm1379_vm6 = vcmask 785408  }
  0x19   : > { %1651 = vmatprep.subr.mxu1 %v1923_v1  ;;  %v405_v10 = vld [vmem:[%s306_s16] sm:$0xff]  ;;  %s1926_s16 = smov 112   ;;  %394 = vst.msk [vmem:[#allocation3 + $0x8] sm:$0xff] %vm392_vm5, %v1928_v30  ;;  %395 = vst.msk [vmem:[#allocation3 + $0x10] sm:$0xff] %vm392_vm5, %v1928_v30  ;;  %1819 = vset.pattern.permute.xlu1 %v1929_v33 }
  0x1a   : > { %1652 = vmatpush3.msra.mxu1 %v313_v3  ;;  %v484_v14 = vld [vmem:[%s2322_s4] sm:$0xff]  ;;  %396 = vst.msk [vmem:[#allocation3 + $0x18] sm:$0xff] %vm392_vm5, %v1928_v30  ;;  %397 = vst.msk [vmem:[#allocation4] sm:$0xff] %vm392_vm5, %v1923_v1  ;;  %1820 = vset.pattern.permute.xlu0 %v1929_v33 }
  0x1b   : > { %1653 = vmatprep.subr.mxu1 %v1923_v1  ;;  %398 = vst.msk [vmem:[#allocation4 + $0x8] sm:$0xff] %vm392_vm5, %v1923_v1  ;;  %399 = vst.msk [vmem:[#allocation4 + $0x10] sm:$0xff] %vm392_vm5, %v1923_v1 }
  0x1c   : > { %1654 = vmatpush3.msra.mxu1 %v312_v4  ;;  %400 = vst.msk [vmem:[#allocation4 + $0x18] sm:$0xff] %vm392_vm5, %v1923_v1 }
  0x1d   : > { %1656 = vmatmul.mubr.msk.f32.vlgmr.msra.gmra.mxu1 %vm316_vm1, %v311_v5  ;;  %1658 = vmatprep.subr.mxu1 %v1923_v1 }
  0x1e   : > { %1659 = vmatpush3.msra.mxu1 %v409_v6  ;;  %1666 = vmatprep.mubr.msk.f32.mxu1 %vm1924_vm0, %v1923_v1 }
  0x1f   : > { %1660 = vmatprep.subr.mxu1 %v1923_v1  ;;  %v2145_v46 = vld [vmem:[#allocation3] sm:$0xff] }
  0x20   : > { %1661 = vmatpush3.msra.mxu1 %v408_v7  ;;  %v2155_v50 = vld [vmem:[#allocation3 + $0x8] sm:$0xff]  ;;  %v1021_v53 = vld [vmem:[#allocation3 + $0x10] sm:$0xff] }
  0x21   : > { %1662 = vmatprep.subr.mxu1 %v1923_v1  ;;  %v1214_v57 = vld [vmem:[#allocation3 + $0x18] sm:$0xff] }
  0x22   : > { %1663 = vmatpush3.msra.mxu1 %v407_v8 }
  0x23   : > { %1664 = vmatprep.subr.mxu1 %v1923_v1 }
  0x24   : > { %1665 = vmatpush3.msra.mxu1 %v406_v9 }
  0x25   : > { %1667 = vmatmul.mubr.msk.f32.vlgmr.msra.gmra.mxu1 %vm316_vm1, %v405_v10  ;;  %1669 = vmatprep.subr.mxu1 %v1923_v1 }
  0x26   : > { %1677 = vmatprep.mubr.msk.f32.mxu1 %vm1924_vm0, %v1923_v1  ;;  %1670 = vmatpush3.msra.mxu1 %v487_v11 }
  0x27   : > { %1671 = vmatprep.subr.mxu1 %v1923_v1 }
  0x28   : > { %1672 = vmatpush3.msra.mxu1 %v486_v12 }
  0x29   : > { %1673 = vmatprep.subr.mxu1 %v1923_v1 }
  0x2a   : > { %1674 = vmatpush3.msra.mxu1 %v485_v13 }
  0x2b   : > { %1675 = vmatprep.subr.mxu1 %v1923_v1 }
  0x2c   : > { %1676 = vmatpush3.msra.mxu1 %v484_v14 }
  0x2d   : > { %1678 = vmatmul.mubr.msk.f32.vlgmr.msra.gmra.mxu1 %vm316_vm1, %v405_v10  ;;  %1680 = vmatprep.subr.mxu1 %v1923_v1 }
  0x2e   : > { %1682 = vmatprep.mubr.msk.f32.mxu1 %vm1924_vm0, %v1923_v1 }
  0xdd   : > { %v386_v15 = vpop.f32.mrf.mxu1 }
  0xde   : > { %391 = vst.msk [vmem:[#allocation2] sm:$0xff] %vm390_vm2, %v386_v15 }
  0xdf   : > { %v1657_v16 = vpop.f32.mrf.mxu1 }
  0xe5   : > { %v480_v17 = vpop.f32.mrf.mxu1  ;;  %v558_v19 = vld [vmem:[#allocation2] sm:$0xff] }
  0xe6   : > { %943 = vrot.lane.b32.xlu1 %v480_v17, %s1925_s15  ;;  %749 = vrot.lane.b32.xlu0 %v480_v17, %s1926_s16 }
  0xe7   : > { %1681 = vmatpush3.xpose.msk.msra.mxu1 %vm559_vm3, %v480_v17  ;;  %v1668_v18 = vpop.f32.mrf.mxu1 }
  0xe8   : > { %1685 = vmatprep.subr.mxu1 %v1923_v1 }
  0xea   : > { %1683 = vmatmul.mubr.msk.f32.vlgmr.msra.gmra.mxu1 %vm559_vm3, %v558_v19  ;;  %941 = vrot.lane.b32.xlu1 %v558_v19, %s1925_s15 }
  0xeb   : > { %747 = vrot.lane.b32.xlu0 %v558_v19, %s1926_s16  ;;  %1687 = vmatprep.mubr.msk.f32.mxu1 %vm1924_vm0, %v1923_v1 }
  0xed   : > { %v2110_v20 = vpop.f32.mrf.mxu1 }
  0xee   : > { %1134 = vrot.lane.b32.xlu1 %v558_v19, %s1927_s17  ;;  %1686 = vmatpush3.msra.mxu1 %v2110_v20 }
  0xef   : > { %1136 = vrot.lane.b32.xlu0 %v480_v17, %s1927_s17  ;;  %v1679_v21 = vpop.f32.mrf.mxu1  ;;  %1695 = vmatprep.subr.mxu1 %v1923_v1  ;;  %s1596_s17 = sshll.u32 %s1913_s24, 7  ;;  %s1932_s24 = smov [#allocation6]  }
  0xf0   : > { %s2271_s30 = scalar_lea.hbm %s2324_s6, %s1596_s17  ;;  %s1849_s12 = sshll.u32 %s1932_s24, 4  ;;  %s1850_s12 = int_to_ptr.vmem [resolvable:$false] %s1849_s12 }
  0xf1   : > { %s1851_s13 = scalar_lea.vmem %s1850_s12, 256 }
 0x158   : > { %v750_v22 = vpop.permute.xlu0 %749  ;;  %v944_v23 = vpop.permute.xlu1 %943 }
 0x159   : > { %1691 = vmatpush3.xpose.msk.msra.mxu0 %vm559_vm3, %v750_v22 }
 0x15a   : > { %1700 = vmatprep.subr.mxu0 %v1923_v1 }
 0x15c   : > { %v942_v25 = vpop.permute.xlu1 %941 }
 0x15d   : > { %v748_v24 = vpop.permute.xlu0 %747 }
 0x15e   : > { %1693 = vmatmul.mubr.msk.f32.vlgmr.msra.gmra.mxu0 %vm559_vm3, %v748_v24 }
 0x15f   : > { %1701 = vmatpush3.xpose.msk.msra.mxu0 %vm559_vm3, %v944_v23  ;;  %1702 = vmatprep.mubr.msk.f32.mxu0 %vm1924_vm0, %v1923_v1 }
 0x160   : > { %1710 = vmatprep.subr.mxu0 %v1923_v1  ;;  %v1135_v27 = vpop.permute.xlu1 %1134 }
 0x161   : > { %v1137_v26 = vpop.permute.xlu0 %1136 }
 0x162   : > { %1703 = vmatmul.mubr.msk.f32.vlgmr.msra.gmra.mxu0 %vm559_vm3, %v942_v25 }
 0x163   : > { %1711 = vmatpush3.xpose.msk.msra.mxu0 %vm559_vm3, %v1137_v26  ;;  %1712 = vmatprep.mubr.msk.f32.mxu0 %vm1924_vm0, %v1923_v1 }
 0x164   : > { %1720 = vmatprep.subr.mxu0 %v1923_v1 }
 0x166   : > { %1713 = vmatmul.mubr.msk.f32.vlgmr.msra.gmra.mxu0 %vm559_vm3, %v1135_v27 }
 0x167   : > { %1752 = vmatprep.mubr.msk.f32.mxu0 %vm1924_vm0, %v1923_v1 }
 0x1aa   : > { %v632_v28 = vpop.f32.mrf.mxu1 }
 0x1ab   : > { %v636_v29 = vmul.f32 0.25, %v632_v28 }
 0x1ac   : > { %v1684_v31 = vpop.f32.mrf.mxu1 }
 0x1ad   : > { %v639_v32 = vsel %vm638_vm4, %v636_v29, -inf  ;;  %v844_v31 = vld [vmem:[#allocation4 + $0x8] sm:$0xff] }
 0x1ae   : > { %640 = vmax.xlane.f32.xlu0 %v639_v32 }
 0x21e   : > { %v821_v34 = vpop.f32.mrf.mxu0 }
 0x21f   : > { %v825_v35 = vmul.f32 0.25, %v821_v34  ;;  %v1038_v34 = vld [vmem:[#allocation4 + $0x10] sm:$0xff] }
 0x220   : > { %v1694_v36 = vpop.f32.mrf.mxu0 }
 0x221   : > { %v828_v37 = vsel %vm638_vm4, %v825_v35, -inf }
 0x222   : > { %829 = vmax.xlane.f32.xlu1 %v828_v37  ;;  %v1015_v38 = vpop.f32.mrf.mxu0 }
 0x223   : > { %v1019_v39 = vmul.f32 0.25, %v1015_v38  ;;  %v1231_v38 = vld [vmem:[#allocation4 + $0x18] sm:$0xff] }
 0x224   : > { %v1704_v40 = vpop.f32.mrf.mxu0 }
 0x225   : > { %v1022_v41 = vsel %vm638_vm4, %v1019_v39, -inf }
 0x226   : > { %v1208_v42 = vpop.f32.mrf.mxu0  ;;  %1023 = vmax.xlane.f32.xlu0 %v1022_v41 }
 0x227   : > { %v1212_v43 = vmul.f32 0.25, %v1208_v42 }
 0x228   : > { %v1714_v44 = vpop.f32.mrf.mxu0 }
 0x229   : > { %v1215_v45 = vsel %vm638_vm4, %v1212_v43, -inf }
 0x22a   : > { %1216 = vmax.xlane.f32.xlu0 %v1215_v45 }
 0x237   : > { %v641_v47 = vpop.xlane.xlu0 %640 }
 0x238   : > { %v2148_v48 = vmax.f32 %v2145_v46, %v641_v47 }
 0x23a   : > { %v643_v49 = vsub.f32 %v2145_v46, %v2148_v48  ;;  %744 = vst.msk [vmem:[#allocation3] sm:$0xff] %vm392_vm5, %v2148_v48  ;;  %648 = vperm.xlu1 %1819, %v2148_v48  }
 0x23c   : > { %v644_v30 = vmul.f32 1.442695, %v643_v49 }
 0x2ab   : > { %v830_v51 = vpop.xlane.xlu1 %829 }
 0x2ac   : > { %v831_v52 = vmax.f32 %v2155_v50, %v830_v51 }
 0x2ae   : > { %v832_v54 = vsub.f32 %v2155_v50, %v831_v52  ;;  %938 = vst.msk [vmem:[#allocation3 + $0x8] sm:$0xff] %vm392_vm5, %v831_v52  ;;  %837 = vperm.xlu0 %1820, %v831_v52  }
 0x2af   : > { %v1024_v55 = vpop.xlane.xlu0 %1023 }
 0x2b0   : > { %v1025_v56 = vmax.f32 %v1021_v53, %v1024_v55  ;;  %v833_v21 = vmul.f32 1.442695, %v832_v54 }
 0x2b2   : > { %v1026_v58 = vsub.f32 %v1021_v53, %v1025_v56  ;;  %1131 = vst.msk [vmem:[#allocation3 + $0x10] sm:$0xff] %vm392_vm5, %v1025_v56  ;;  %1031 = vperm.xlu1 %1819, %v1025_v56   ;;  %v1396_v56 = vld [vmem:[%s2323_s5 + $0x78] sm:$0xff] }
 0x2b3   : > { %v1217_v59 = vpop.xlane.xlu0 %1216  ;;  %1721 = vmatpush3.msra.mxu0 %v1396_v56 }
 0x2b4   : > { %v1218_v60 = vmax.f32 %v1214_v57, %v1217_v59  ;;  %v1027_v22 = vmul.f32 1.442695, %v1026_v58  ;;  %1722 = vmatprep.subr.mxu0 %v1923_v1  ;;  %v1394_v58 = vld [vmem:[%s2323_s5 + $0x68] sm:$0xff]  ;;  %v1393_v59 = vld [vmem:[%s2323_s5 + $0x60] sm:$0xff] }
 0x2b5   : > { %v649_v61 = vpop.permute.xlu1 %648 }
 0x2b6   : > { %v1219_v62 = vsub.f32 %v1214_v57, %v1218_v60  ;;  %1324 = vst.msk [vmem:[#allocation3 + $0x18] sm:$0xff] %vm392_vm5, %v1218_v60  ;;  %v651_v63 = vsub.f32 %v636_v29, %v649_v61  ;;  %1224 = vperm.xlu1 %1819, %v1218_v60   ;;  %v1395_v57 = vld [vmem:[%s2323_s5 + $0x70] sm:$0xff]  ;;  %v1392_v60 = vld [vmem:[%s2323_s5 + $0x58] sm:$0xff] }
 0x2b7   : > { %1723 = vmatpush3.msra.mxu0 %v1395_v57  ;;  %v1391_v61 = vld [vmem:[%s2323_s5 + $0x50] sm:$0xff] }
 0x2b8   : > { %v652_v0 = vmul.f32 1.442695, %v651_v63  ;;  %v1220_v24 = vmul.f32 1.442695, %v1219_v62  ;;  %1724 = vmatprep.subr.mxu0 %v1923_v1  ;;  %v852_v62 = vld [vmem:[#allocation5 + $0x8] sm:$0xff] }
 0x2b9   : > { %1725 = vmatpush3.msra.mxu0 %v1394_v58 }
 0x2ba   : > { %860 = vrot.lane.b32.xlu1 %v2110_v20, %s1925_s15  ;;  %1821 = vpow2.f32 %v652_v0  ;;  %1726 = vmatprep.subr.mxu0 %v1923_v1  ;;  %v1390_v0 = vld [vmem:[%s2323_s5 + $0x48] sm:$0xff] }
 0x2bb   : > { %1727 = vmatpush3.msra.mxu0 %v1393_v59 }
 0x2bc   : > { %1728 = vmatprep.subr.mxu0 %v1923_v1 }
 0x2bd   : > { %1729 = vmatpush3.msra.mxu0 %v1392_v60 }
 0x2be   : > { %1053 = vrot.lane.b32.xlu1 %v2110_v20, %s1930_s19  ;;  %1730 = vmatprep.subr.mxu0 %v1923_v1 }
 0x2bf   : > { %1731 = vmatpush3.msra.mxu0 %v1391_v61 }
 0x2c0   : > { %1732 = vmatprep.subr.mxu0 %v1923_v1 }
 0x2c1   : > { %1733 = vmatpush3.msra.mxu0 %v1390_v0 }
 0x2c2   : > { %1246 = vrot.lane.b32.xlu1 %v2110_v20, %s1931_s20  ;;  %1734 = vmatprep.subr.mxu0 %v1923_v1 }
 0x2c7   : > { %v1822_v2 = vpop.eup %1821 }
 0x2c8   : > { %1688 = vmatmul.mubr.msk.f32.vlgmr.msra.gmra.mxu1 %vm638_vm4, %v1822_v2  ;;  %v656_v23 = vsel %vm638_vm4, %v1822_v2, 0.0 }
 0x2c9   : > { %1697 = vmatprep.mubr.msk.f32.mxu1 %vm1924_vm0, %v1923_v1 }
 0x329   : > { %v838_v3 = vpop.permute.xlu0 %837 }
 0x32a   : > { %v840_v4 = vsub.f32 %v825_v35, %v838_v3 }
 0x32c   : > { %v841_v5 = vmul.f32 1.442695, %v840_v4  ;;  %v1389_v4 = vld [vmem:[%s2323_s5 + $0x40] sm:$0xff] }
 0x32d   : > { %v1032_v6 = vpop.permute.xlu1 %1031  ;;  %1735 = vmatpush3.msra.mxu0 %v1389_v4 }
 0x32e   : > { %1823 = vpow2.f32 %v841_v5  ;;  %v1034_v7 = vsub.f32 %v1019_v39, %v1032_v6  ;;  %v1046_v5 = vld [vmem:[#allocation5 + $0x10] sm:$0xff]  ;;  %1736 = vmatprep.subr.mxu0 %v1923_v1 }
 0x330   : > { %v1035_v8 = vmul.f32 1.442695, %v1034_v7 }
 0x331   : > { %v1225_v9 = vpop.permute.xlu1 %1224 }
 0x332   : > { %1825 = vpow2.f32 %v1035_v8  ;;  %v1227_v10 = vsub.f32 %v1212_v43, %v1225_v9  ;;  %v654_v43 = vld [vmem:[#allocation4] sm:$0xff]  ;;  %v1388_v8 = vld [vmem:[%s2323_s5 + $0x38] sm:$0xff] }
 0x333   : > { %1737 = vmatpush3.msra.mxu0 %v1388_v8 }
 0x334   : > { %v1228_v11 = vmul.f32 1.442695, %v1227_v10  ;;  %1738 = vmatprep.subr.mxu0 %v1923_v1 }
 0x335   : > { %v861_v12 = vpop.permute.xlu1 %860 }
 0x336   : > { %1827 = vpow2.f32 %v1228_v11  ;;  %1696 = vmatpush3.msra.mxu1 %v861_v12  ;;  %v1387_v11 = vld [vmem:[%s2323_s5 + $0x30] sm:$0xff]  ;;  %v1239_v12 = vld [vmem:[#allocation5 + $0x18] sm:$0xff] }
 0x337   : > { %1705 = vmatprep.subr.mxu1 %v1923_v1  ;;  %1829 = vpow2.f32 %v833_v21  ;;  %1739 = vmatpush3.msra.mxu0 %v1387_v11 }
 0x338   : > { %1831 = vpow2.f32 %v1027_v22  ;;  %1740 = vmatprep.subr.mxu0 %v1923_v1  ;;  %v1385_v22 = vld [vmem:[%s2323_s5 + $0x20] sm:$0xff] }
 0x339   : > { %v1054_v13 = vpop.permute.xlu1 %1053  ;;  %1833 = vpow2.f32 %v1220_v24  ;;  %v1383_v24 = vld [vmem:[%s2323_s5 + $0x10] sm:$0xff] }
 0x33a   : > { %1835 = vpow2.f32 %v644_v30 }
 0x33b   : > { %v1824_v14 = vpop.eup %1823 }
 0x33c   : > { %1698 = vmatmul.mubr.msk.f32.vlgmr.msra.gmra.mxu1 %vm638_vm4, %v1824_v14  ;;  %v846_v15 = vsel %vm638_vm4, %v1824_v14, 0.0 }
 0x33d   : > { %1706 = vmatpush3.msra.mxu1 %v1054_v13  ;;  %847 = vadd.xlane.f32.xlu1 %v846_v15  ;;  %v1247_v17 = vpop.permute.xlu1 %1246 }
 0x33e   : > { %1707 = vmatprep.mubr.msk.f32.mxu1 %vm1924_vm0, %v1923_v1  ;;  %1715 = vmatprep.subr.mxu1 %v1923_v1 }
 0x33f   : > { %v1826_v16 = vpop.eup %1825 }
 0x340   : > { %1708 = vmatmul.mubr.msk.f32.vlgmr.msra.gmra.mxu1 %vm638_vm4, %v1826_v16  ;;  %v1040_v18 = vsel %vm638_vm4, %v1826_v16, 0.0  ;;  %v1386_v16 = vld [vmem:[%s2323_s5 + $0x28] sm:$0xff] }
 0x341   : > { %1716 = vmatpush3.msra.mxu1 %v1247_v17  ;;  %1041 = vadd.xlane.f32.xlu0 %v1040_v18 }
 0x342   : > { %1717 = vmatprep.mubr.msk.f32.mxu1 %vm1924_vm0, %v1923_v1  ;;  %1741 = vmatpush3.msra.mxu0 %v1386_v16 }
 0x343   : > { %v1828_v19 = vpop.eup %1827  ;;  %1742 = vmatprep.subr.mxu0 %v1923_v1 }
 0x344   : > { %1718 = vmatmul.mubr.msk.f32.vlgmr.msra.gmra.mxu1 %vm638_vm4, %v1828_v19  ;;  %v1233_v20 = vsel %vm638_vm4, %v1828_v19, 0.0  ;;  %v1830_v25 = vpop.eup %1829  ;;  %1743 = vmatpush3.msra.mxu0 %v1385_v22 }
 0x345   : > { %1234 = vadd.xlane.f32.xlu1 %v1233_v20  ;;  %v1832_v26 = vpop.eup %1831  ;;  %v845_v32 = vmul.f32 %v1830_v25, %v844_v31  ;;  %1744 = vmatprep.subr.mxu0 %v1923_v1 }
 0x346   : > { %v1834_v27 = vpop.eup %1833  ;;  %v1039_v36 = vmul.f32 %v1832_v26, %v1038_v34  ;;  %v662_v34 = vld [vmem:[#allocation5] sm:$0xff] }
 0x347   : > { %v1232_v40 = vmul.f32 %v1834_v27, %v1231_v38  ;;  %v1836_v41 = vpop.eup %1835 }
 0x348   : > { %v655_v46 = vmul.f32 %v1836_v41, %v654_v43 }
 0x349   : > { %657 = vadd.xlane.f32.xlu1 %v656_v23  ;;  %v1384_v23 = vld [vmem:[%s2323_s5 + $0x18] sm:$0xff] }
 0x34a   : > { %1745 = vmatpush3.msra.mxu0 %v1384_v23 }
 0x34b   : > { %1746 = vmatprep.subr.mxu0 %v1923_v1 }
 0x34c   : > { %1747 = vmatpush3.msra.mxu0 %v1383_v24 }
 0x34d   : > { %1748 = vmatprep.subr.mxu0 %v1923_v1 }
 0x357   : > { %855 = vperm.xlu0 %1820, %v1830_v25   ;;  %v1382_v25 = vld [vmem:[%s2323_s5 + $0x8] sm:$0xff] }
 0x358   : > { %1749 = vmatpush3.msra.mxu0 %v1382_v25 }
 0x359   : > { %1750 = vmatprep.subr.mxu0 %v1923_v1 }
 0x35a   : > { %1049 = vperm.xlu1 %1819, %v1832_v26   ;;  %v1381_v26 = vld [vmem:[%s2323_s5] sm:$0xff] }
 0x35b   : > { %1751 = vmatpush3.msra.mxu0 %v1381_v26 }
 0x35e   : > { %1242 = vperm.xlu1 %1819, %v1834_v27  }
 0x388   : > { %v2184_v28 = vpop.f32.mrf.mxu1 }
 0x38a   : > { %v1689_v29 = vpop.f32.mrf.mxu1 }
 0x3c6   : > { %v848_v33 = vpop.xlane.xlu1 %847 }
 0x3c7   : > { %v849_v35 = vadd.f32 %v848_v33, %v845_v32 }
 0x3c9   : > { %850 = vst.msk [vmem:[#allocation4 + $0x8] sm:$0xff] %vm392_vm5, %v849_v35 }
 0x3ca   : > { %v1042_v37 = vpop.xlane.xlu0 %1041 }
 0x3cb   : > { %v1043_v39 = vadd.f32 %v1042_v37, %v1039_v36 }
 0x3cd   : > { %1044 = vst.msk [vmem:[#allocation4 + $0x10] sm:$0xff] %vm392_vm5, %v1043_v39 }
 0x3ce   : > { %v1235_v42 = vpop.xlane.xlu1 %1234 }
 0x3cf   : > { %v1236_v44 = vadd.f32 %v1235_v42, %v1232_v40 }
 0x3d0   : > { %v1337_v45 = vld [vmem:[#allocation4 + $0x8] sm:$0xff] }
 0x3d1   : > { %1237 = vst.msk [vmem:[#allocation4 + $0x18] sm:$0xff] %vm392_vm5, %v1236_v44  ;;  %1837 = vrcp.f32 %v1337_v45 }
 0x3d2   : > { %v658_v47 = vpop.xlane.xlu1 %657  ;;  %v856_v63 = vpop.permute.xlu0 %855 }
 0x3d3   : > { %v659_v48 = vadd.f32 %v658_v47, %v655_v46  ;;  %v858_v3 = vmul.f32 %v856_v63, %v852_v62 }
 0x3d4   : > { %v1346_v49 = vld [vmem:[#allocation4 + $0x10] sm:$0xff] }
 0x3d5   : > { %661 = vst.msk [vmem:[#allocation4] sm:$0xff] %vm392_vm5, %v659_v48  ;;  %1839 = vrcp.f32 %v1346_v49 }
 0x3d6   : > { %v1050_v2 = vpop.permute.xlu1 %1049 }
 0x3d7   : > { %v1052_v10 = vmul.f32 %v1050_v2, %v1046_v5 }
 0x3d8   : > { %v1355_v50 = vld [vmem:[#allocation4 + $0x18] sm:$0xff] }
 0x3d9   : > { %1841 = vrcp.f32 %v1355_v50 }
 0x3da   : > { %v1243_v13 = vpop.permute.xlu1 %1242 }
 0x3db   : > { %v1245_v18 = vmul.f32 %v1243_v13, %v1239_v12 }
 0x3dc   : > { %v1328_v51 = vld [vmem:[#allocation4] sm:$0xff] }
 0x3dd   : > { %1843 = vrcp.f32 %v1328_v51 }
 0x3de   : > { %v1838_v52 = vpop.eup %1837 }
 0x3df   : > { %1342 = vperm.xlu0 %1820, %v1838_v52  }
 0x3e2   : > { %v1840_v53 = vpop.eup %1839 }
 0x3e3   : > { %1351 = vperm.xlu1 %1819, %v1840_v53  }
 0x3e6   : > { %v1842_v54 = vpop.eup %1841 }
 0x3e7   : > { %1360 = vperm.xlu0 %1820, %v1842_v54   ;;  %665 = vperm.xlu1 %1819, %v1836_v41  }
 0x3ea   : > { %v1844_v55 = vpop.eup %1843 }
 0x3eb   : > { %1333 = vperm.xlu0 %1820, %v1844_v55  }
 0x3fc   : > { %v932_v6 = vpop.f32.mrf.mxu1 }
 0x3fd   : > { %v936_v7 = vadd.f32 %v932_v6, %v858_v3 }
 0x3fe   : > { %v1699_v9 = vpop.f32.mrf.mxu1 }
 0x3ff   : > { %937 = vst.msk [vmem:[#allocation5 + $0x8] sm:$0xff] %vm316_vm1, %v936_v7 }
 0x400   : > { %v1125_v14 = vpop.f32.mrf.mxu1 }
 0x401   : > { %v1129_v15 = vadd.f32 %v1125_v14, %v1052_v10 }
 0x402   : > { %v1709_v17 = vpop.f32.mrf.mxu1 }
 0x403   : > { %1130 = vst.msk [vmem:[#allocation5 + $0x10] sm:$0xff] %vm316_vm1, %v1129_v15 }
 0x404   : > { %v1318_v19 = vpop.f32.mrf.mxu1 }
 0x405   : > { %v1322_v20 = vadd.f32 %v1318_v19, %v1245_v18 }
 0x406   : > { %v1719_v21 = vpop.f32.mrf.mxu1  ;;  %v1339_v29 = vld [vmem:[#allocation5 + $0x8] sm:$0xff] }
 0x407   : > { %1323 = vst.msk [vmem:[#allocation5 + $0x18] sm:$0xff] %vm316_vm1, %v1322_v20 }
 0x40a   : > { %v1348_v32 = vld [vmem:[#allocation5 + $0x10] sm:$0xff] }
 0x40e   : > { %v1357_v37 = vld [vmem:[#allocation5 + $0x18] sm:$0xff] }
 0x45a   : > { %v1343_v27 = vpop.permute.xlu0 %1342 }
 0x45b   : > { %v1345_v30 = vmul.f32 %v1343_v27, %v1339_v29 }
 0x45d   : > { %1365 = vrot.lane.b32.xlu1 %v1345_v30, %s1931_s20 }
 0x45e   : > { %v1352_v31 = vpop.permute.xlu1 %1351 }
 0x45f   : > { %v1354_v33 = vmul.f32 %v1352_v31, %v1348_v32 }
 0x461   : > { %1369 = vrot.lane.b32.xlu0 %v1354_v33, %s1930_s19  ;;  %s290_s19 = sand.u32 1, %s1905_s22  }
 0x462   : > { %v666_v35 = vpop.permute.xlu1 %665  ;;  %v1361_v36 = vpop.permute.xlu0 %1360  ;;  %s1577_s20 = sshll.u32 %s290_s19, 3  ;;  %s1469_s8 = scalar_lea.sflag [#allocation7], %s290_s19 }
 0x463   : > { %v668_v1 = vmul.f32 %v666_v35, %v662_v34  ;;  %v1363_v38 = vmul.f32 %v1361_v36, %v1357_v37 }
 0x465   : > { %v742_v39 = vadd.f32 %v2184_v28, %v668_v1  ;;  %1373 = vrot.lane.b32.xlu1 %v1363_v38, %s1925_s15  ;;  %s292_s15 = scalar_lea.vmem [#allocation6], %s1577_s20 }
 0x466   : > { %v1334_v40 = vpop.permute.xlu0 %1333  ;;  %s1483_s27 = sshll.u32 %s292_s15, 4  ;;  %s2273_s27 = int_to_ptr.vmem [resolvable:$true] %s1483_s27 }
 0x467   : > { %743 = vst.msk [vmem:[#allocation5] sm:$0xff] %vm316_vm1, %v742_v39  ;;  %s1845_s11 = scalar_lea.vmem %s2273_s27, 128  ;;  %p1852_p1 = scmp.lt.s32.totalorder %s2273_s27, %s1850_s12 }
 0x468   : > { %p1846_p12 = scmp.ne.s32.totalorder %s2273_s27, %s1845_s11  ;;  %p1853_p2 = scmp.lt.s32.totalorder %s1851_s13, %s1845_s11 }
 0x46a   : > { %p1847_p13 = pnand %p1846_p12, %p2008_p4  ;;  %p1854_p3 = por %p1853_p2, %p1852_p1 }
 0x46c   : > { %p1848_p0 = pneg %p1847_p13 }
 0x46e   : > { %v1330_v41 = vld [vmem:[#allocation5] sm:$0xff]  ;;  %p1855_p5 = pnand %p1854_p3, %p1848_p0 }
 0x46f   : > { %v1336_v43 = vmul.f32 %v1334_v40, %v1330_v41 }
 0x4cf   : > { %v1366_v42 = vpop.permute.xlu1 %1365 }
 0x4d0   : > { %v1376_v45 = vsel %vm316_vm1, %v1336_v43, %v1366_v42 }
 0x4d3   : > { %v1370_v44 = vpop.permute.xlu0 %1369 }
 0x4d4   : > { %v1378_v46 = vsel %vm390_vm2, %v1376_v45, %v1370_v44 }
 0x4d7   : > { %v1374_v47 = vpop.permute.xlu1 %1373 }
 0x4d8   : > { %v1380_v48 = vsel %vm1379_vm6, %v1378_v46, %v1374_v47 }
 0x4d9   : > { %1753 = vmatmul.mubr.f32.vlgmr.msra.gmra.mxu0 %v1380_v48 }
 0x599   : > { %v1463_v28 = vpop.f32.mrf.mxu0 }
 0x59a   : > { %1467 = vst.msk [vmem:[%s292_s15] sm:$0xff] %vm316_vm1, %v1463_v28 }
 0x59b   : > { %v1754_v49 = vpop.f32.mrf.mxu0 }
 0x59c   : > { %1858 = shalt.err (!%p1855_p5)
}
 0x59d   : > { %s1859_s14 = scalar_lea.hbm %s2271_s30, 128  ;;  %s1863_s20 = scalar_lea.hbm %s2324_s6, 256 }
 0x59e   : > { %p1860_p6 = scmp.ne.s32.totalorder %s2271_s30, %s1859_s14  ;;  %p1864_p10 = scmp.lt.s32.totalorder %s2271_s30, %s2324_s6 }
 0x59f   : > { %p1865_p11 = scmp.lt.s32.totalorder %s1863_s20, %s1859_s14 }
 0x5a0   : > { %p1861_p7 = pnand %p1860_p6, %p2008_p4 }
 0x5a1   : > { %p1866_p12 = por %p1865_p11, %p1864_p10 }
 0x5a2   : > { %p1862_p9 = pneg %p1861_p7 }
 0x5a4   : > { %p1867_p13 = pnand %p1866_p12, %p1862_p9 }
 0x5a6   : > { %1870 = shalt.err (!%p1867_p13)
}
 0x5a7   : > { %1755 = dma.vmem_to_hbm [thread:$0]  (%p2008_p4), %s2273_s27, 128, %s2271_s30, %s1469_s8  }
 0x5a8 PF: > { %p1761_p0 = scmp.ge.s32.totalorder %s1921_s26, 2  ;;  %s1495_s18 = sand.u32 1, %s1901_s21  }
 0x5a9   : > { %s1496_s28 = scalar_lea.sflag [#allocation7], %s1495_s18 }
 0x5aa   : > { %p1758_p1 = pnand %p1761_p0, %p2015_p8 }
 0x5ac   : > { %p1759_p2 = pneg %p1758_p1 }
 0x5ae   : > { %1896 = dma.done.wait (%p1759_p2), %s1496_s28, 128  }
 0x5af   : > { %1898 = vsyncadd (%p1759_p2), %s1496_s28, 4294967168  ;;  %s19_s26 = sadd.s32 1, %s1921_s26   ;;  %s2327_s21 = smov %s1905_s22 }
 0x5b0   : > { %p16_p3 = scmp.ge.s32.totalorder %s19_s26, 4   ;;  %s2328_s22 = smov %s1909_s23 }
 0x5b1   : > { %s2329_s23 = smov %s2021_s10  ;;  %s2330_s24 = smov %s1917_s25 }
 0x5b2   : > { %s2331_s25 = smov %s2333_s29  ;;  %18 = sbr.rel (!%p16_p3) target bundleno = 4 (0x4), region = 99 }
 0x5b7   :  { %1501 = vsyncpa [#allocation7], 1 }
 0x5b8   :  { %1503 = vsyncpa [#allocation7 + $0x1], 1 }

</bundles_post_ra>
